<compile_context>
chip_gen: v7x
topology: tpu7x:2x2x1
jax: 0.10.0
libtpu: 0.0.40
codegen_flags: <defaults>
</compile_context>

<pallas_src>
import jax
import jax.numpy as jnp
import numpy as np
from jax import lax
from jax.experimental import pallas as pl
from jax.experimental.pallas import tpu as pltpu

EPSILON = 1e-10
BOS_TOKEN_ID = 1
NEG_INF = -1e30
MASK_REP = 16          # sublane rows of the replicated mask block (bf16 tile)


def _round_up(x, m):
    return ((x + m - 1) // m) * m


def _vmem_limit_bytes():
    """Scoped VMEM limit: ~3/4 of physical VMEM, capped at 96 MiB.
    v7x (64 MiB physical) -> 48 MiB; v5e/v6e (128 MiB) -> 96 MiB."""
    cap = 64 * 1024 * 1024
    try:
        info = pltpu.get_tpu_info()
        cap = int(getattr(info, "vmem_capacity_bytes", cap))
    except Exception:
        pass
    return int(min((cap * 3) // 4, 96 * 1024 * 1024))


def _choose_batch_block(B):
    # Keep grid[0] >= 2 for B >= 16 so the "parallel" batch axis can shard
    # across v7x's two TensorCores; otherwise take the whole batch per block.
    return 8 if (B > 8 and B % 8 == 0) else B


def _choose_seq_tile(bB, D, T, vmem_limit):
    """Sequence tile: multiple of 128 (lane-dense mask block), sized so the
    two double-buffered bf16 hidden tiles use <= ~half the VMEM limit and
    each DMA is multi-MiB (amortizes the ~0.35us per-grid-step overhead)."""
    per_buf = max(1 << 20, vmem_limit // 4)
    bt = per_buf // max(1, bB * D * 2)          # bf16 = 2 bytes / element
    bt = (bt // 128) * 128
    bt = max(128, min(1024, bt))
    return min(bt, _round_up(T, 128))           # don't pad far past the sequence


# ----------------------------------------------------------------------------
# Pallas kernel: masked mean pooling (T-reduction on MXU) + Linear head
#                + log_softmax
# ----------------------------------------------------------------------------
def disc_head_kernel(hidden_ref, mask_ref, den_ref, w_ref, b_ref, out_ref,
                     sum_sc):
    # hidden_ref: [bB, bT, D]         bf16  decoder hidden-state tile
    # mask_ref:   [bB, MASK_REP, bT]  bf16  0/1 mask (row 0 real, rows 1..15 = 0)
    # den_ref:    [bB, 1]             f32   sum of mask over T (precomputed)
    # w_ref:      [D, Cpad]           f32   classifier weight^T, 0-padded cols
    # b_ref:      [1, Cpad]           f32   classifier bias, -1e30 in padded cols
    # out_ref:    [bB, Cpad]          f32   log-probabilities (padded cols garbage)
    # sum_sc:     [bB, D]             f32   running masked sum over T
    t = pl.program_id(1)

    @pl.when(t == 0)
    def _init():
        sum_sc[...] = jnp.zeros_like(sum_sc)

    # Masked sum over this sequence tile on the MXU (bf16 in, f32 accumulate):
    #   [bB, MASK_REP, bT] x [bB, bT, D] -> [bB, MASK_REP, D]   ('bmt,btd->bmd')
    # Mask values are exactly 0/1 in bf16 and only row 0 is non-zero, so
    # summing over the MASK_REP axis recovers exactly sum_t mask[t]*hidden[t].
    partial = lax.dot_general(
        mask_ref[...], hidden_ref[...],
        dimension_numbers=(((2,), (1,)), ((0,), (0,))),
        preferred_element_type=jnp.float32)                    # [bB, MASK_REP, D]
    sum_sc[...] += jnp.sum(partial, axis=1)                    # [bB, D]

    @pl.when(t == pl.num_programs(1) - 1)
    def _finalize():
        # avg_hidden = sum(masked_hidden, dim=1) / (sum(mask, dim=1) + EPSILON)
        avg_hidden = sum_sc[...] / (den_ref[...] + EPSILON)    # [bB, D]

        # logits = avg_hidden @ W^T + b   (ClassificationHead.mlp)
        # Padded columns: W == 0 and bias == -1e30, so they vanish under the
        # log_softmax over the real classes.
        logits = jnp.dot(avg_hidden, w_ref[...],
                         preferred_element_type=jnp.float32) + b_ref[...]

        # probs = log_softmax(logits, dim=-1)  (exact; once per batch block)
        m = jnp.max(logits, axis=-1, keepdims=True)
        shifted = logits - m
        lse = jnp.log(jnp.sum(jnp.exp(shifted), axis=-1, keepdims=True))
        out_ref[...] = shifted - lse


# ----------------------------------------------------------------------------
# Wrapper: padding / BlockSpecs / grid
# ----------------------------------------------------------------------------
def discriminator_head(hidden, mask_rep, den, cls_w, cls_b, *, seq_tile):
    """hidden: [B, T_pad, D] bf16, mask_rep: [B, MASK_REP, T_pad] bf16
       (row 0 = 0/1 mask, other rows 0), den: [B, 1] f32 (token counts),
       cls_w: [C, D] f32, cls_b: [C] f32.  Returns log-probs [B, C] f32."""
    B, T_pad, D = hidden.shape
    C = cls_w.shape[0]
    assert seq_tile % 128 == 0 and T_pad % seq_tile == 0
    assert mask_rep.shape == (B, MASK_REP, T_pad)
    mask_rep = mask_rep.astype(hidden.dtype)

    # --- lane-dense classifier: pad C -> Cpad (multiple of 128)
    Cpad = max(128, _round_up(C, 128))
    w_pad = jnp.zeros((D, Cpad), jnp.float32).at[:, :C].set(
        cls_w.T.astype(jnp.float32))
    b_pad = jnp.full((1, Cpad), NEG_INF, jnp.float32).at[0, :C].set(
        cls_b.astype(jnp.float32))

    bB = _choose_batch_block(B)
    bT = seq_tile
    grid = (B // bB, T_pad // bT)
    vmem_limit = _vmem_limit_bytes()

    cost = pl.CostEstimate(
        flops=int(2 * B * MASK_REP * T_pad * D + 2 * B * D * Cpad + 5 * B * Cpad),
        transcendentals=int(B * (Cpad + 1)),
        bytes_accessed=int(B * T_pad * D * hidden.dtype.itemsize
                           + B * MASK_REP * T_pad * mask_rep.dtype.itemsize
                           + B * 4 + D * Cpad * 4 + Cpad * 4 + B * Cpad * 4),
    )

    out = pl.pallas_call(
        disc_head_kernel,
        out_shape=jax.ShapeDtypeStruct((B, Cpad), jnp.float32),
        grid_spec=pltpu.PrefetchScalarGridSpec(
            num_scalar_prefetch=0,
            grid=grid,
            in_specs=[
                pl.BlockSpec((bB, bT, D), lambda b, t: (b, t, 0)),        # hidden
                pl.BlockSpec((bB, MASK_REP, bT), lambda b, t: (b, 0, t)),  # mask
                pl.BlockSpec((bB, 1), lambda b, t: (b, 0)),               # den
                # NOTE: W / bias have a constant block index; default double
                # buffering costs ~D*Cpad*4 extra VMEM which the seq-tile
                # budget already leaves room for.
                pl.BlockSpec((D, Cpad), lambda b, t: (0, 0)),             # W^T
                pl.BlockSpec((1, Cpad), lambda b, t: (0, 0)),             # bias
            ],
            out_specs=pl.BlockSpec((bB, Cpad), lambda b, t: (b, 0)),
            scratch_shapes=[
                pltpu.VMEM((bB, D), jnp.float32),   # masked-sum accumulator
            ],
        ),
        compiler_params=pltpu.CompilerParams(
            dimension_semantics=("parallel", "arbitrary"),
            vmem_limit_bytes=vmem_limit,
        ),
        cost_estimate=cost,
    )(hidden, mask_rep, den, w_pad, b_pad)

    # Padded columns hold ~-1e30 values; slice before any further use.
    return out[:, :C]


# ----------------------------------------------------------------------------
# Glue (plain JAX): synthetic frozen transformer + mask construction
# ----------------------------------------------------------------------------
def discriminator_forward(ctx_x, text_x, embed_table, cls_w, cls_b, *,
                          seq_tile=None):
    """Mirrors Discriminator.forward (cached_mode=False)."""
    B, S = text_x.shape
    D = embed_table.shape[1]
    T = S + 1

    bB = _choose_batch_block(B)
    if seq_tile is None:
        seq_tile = _choose_seq_tile(bB, D, T, _vmem_limit_bytes())
    T_pad = _round_up(T, seq_tile)

    # decoder inputs: BOS prepended to the response ids
    dec_bos_ids = jnp.full((B, 1), BOS_TOKEN_ID, dtype=text_x.dtype)
    dec_input_ids = jnp.concatenate([dec_bos_ids, text_x], axis=1)        # [B, T]
    # decoder attention mask: [ones(B,1), res != 0]
    dec_attn_mask = jnp.concatenate(
        [jnp.ones((B, 1), dtype=jnp.bool_), text_x != 0], axis=1)         # [B, T]

    # Pad the TINY [B, T] id / mask arrays to the tile size *before* the
    # frozen-transformer stub, so the [B, T_pad, D] hidden state is emitted
    # tile-aligned and bf16 directly — no extra full-HBM jnp.pad / astype
    # pass over the hidden tensor.  Padded ids are 0 and padded mask is 0.
    pad = T_pad - T
    dec_input_ids = jnp.pad(dec_input_ids, ((0, 0), (0, pad)))
    dec_attn_mask = jnp.pad(dec_attn_mask, ((0, 0), (0, pad)))            # [B, T_pad]

    # TODO(synk): the frozen pretrained BlenderbotModel encoder/decoder stack
    # (which consumes ctx_x and the expanded BOS past_key_values) cannot be
    # reproduced without checkpoint weights; it is stubbed by a deterministic
    # bf16 embedding lookup producing the decoder last hidden state.
    last_hidden = jnp.take(embed_table.astype(jnp.bfloat16),
                           dec_input_ids, axis=0)                         # [B, T_pad, D] bf16

    # 0/1 mask as bf16 (exact), placed in row 0 of a MASK_REP-row block
    # (remaining rows zero) so the in-kernel masked sum is a plain
    # (b,m,k)x(b,k,n) MXU matmul.  den = token count per row, computed once
    # here on the tiny [B, T_pad] mask.
    mask_bf16 = dec_attn_mask.astype(jnp.bfloat16)                        # [B, T_pad]
    mask_rep = jnp.pad(mask_bf16[:, None, :],
                       ((0, 0), (0, MASK_REP - 1), (0, 0)))               # [B, MASK_REP, T_pad]
    den = jnp.sum(dec_attn_mask.astype(jnp.float32), axis=1,
                  keepdims=True)                                          # [B, 1]

    return discriminator_head(last_hidden, mask_rep, den, cls_w, cls_b,
                              seq_tile=seq_tile)


# ----------------------------------------------------------------------------
# Pure-JAX reference for correctness check (same bf16-rounded hidden input)
# ----------------------------------------------------------------------------
def reference_forward(ctx_x, text_x, embed_table, cls_w, cls_b):
    B = text_x.shape[0]
    dec_bos_ids = jnp.full((B, 1), BOS_TOKEN_ID, dtype=text_x.dtype)
    dec_input_ids = jnp.concatenate([dec_bos_ids, text_x], axis=1)
    dec_attn_mask = jnp.concatenate(
        [jnp.ones((B, 1), jnp.float32), (text_x != 0).astype(jnp.float32)],
        axis=1)
    hidden = jnp.take(embed_table.astype(jnp.bfloat16), dec_input_ids,
                      axis=0).astype(jnp.float32)
    masked = hidden * dec_attn_mask[:, :, None]
    avg = jnp.sum(masked, axis=1) / (
        jnp.sum(dec_attn_mask, axis=1, keepdims=True) + EPSILON)
    logits = avg @ cls_w.T + cls_b
    return jax.nn.log_softmax(logits, axis=-1)


if __name__ == "__main__":
    # Small shapes consistent with the module's forward:
    #   batch B=2, response seq len 250 (-> decoder seq T=251, padded to 384
    #   with seq_tile=128 so the T-reduction grid has 3 steps),
    #   embed_size D=32, class_size C=5.
    B, S, D, C, VOCAB = 2, 250, 32, 5, 50

    key = jax.random.PRNGKey(0)
    k_ctx, k_res, k_emb, k_w, k_b = jax.random.split(key, 5)

    # token ids (0 = padding) — include padded tails to exercise the mask
    ctx_x = jax.random.randint(k_ctx, (B, S), 0, VOCAB, dtype=jnp.int32)
    text_x = jax.random.randint(k_res, (B, S), 1, VOCAB, dtype=jnp.int32)
    text_x = text_x.at[0, 180:].set(0).at[1, 120:].set(0)

    # deterministic parameter init (synthetic, not a checkpoint load)
    embed_table = jax.random.normal(k_emb, (VOCAB, D), dtype=jnp.float32) * 0.02
    cls_w = jax.random.normal(k_w, (C, D), dtype=jnp.float32) * (1.0 / np.sqrt(D))
    cls_b = jax.random.normal(k_b, (C,), dtype=jnp.float32) * 0.01

    log_probs = discriminator_forward(ctx_x, text_x, embed_table, cls_w, cls_b,
                                      seq_tile=128)
    log_probs = jax.block_until_ready(log_probs)

    ref = jax.block_until_ready(
        reference_forward(ctx_x, text_x, embed_table, cls_w, cls_b))

    np.testing.assert_allclose(np.asarray(log_probs), np.asarray(ref),
                               rtol=1e-4, atol=1e-5)
    assert log_probs.shape == (B, C)
    print("KERNEL_OK")
</pallas_src>

<mosaic_0001>
module attributes {stable_mosaic.version = 11 : i64} {
  func.func @disc_head_kernel(%arg0: i32, %arg1: i32, %arg2: memref<2x128x32xbf16, #tpu.memory_space<vmem>>, %arg3: memref<2x16x128xbf16, #tpu.memory_space<vmem>>, %arg4: memref<2x1xf32, #tpu.memory_space<vmem>>, %arg5: memref<32x128xf32, #tpu.memory_space<vmem>>, %arg6: memref<1x128xf32, #tpu.memory_space<vmem>>, %arg7: memref<2x128xf32, #tpu.memory_space<vmem>>, %arg8: memref<2x32xf32, #tpu.memory_space<vmem>>) attributes {dimension_semantics = [#tpu.dimension_semantics<parallel>, #tpu.dimension_semantics<arbitrary>], iteration_bounds = array<i64: 1, 2>, scalar_prefetch = 0 : i64, scratch_operands = 1 : i64, tpu.core_type = #tpu.core_type<tc>, window_params = [{transform_indices = @transform_0, window_bounds = array<i64: 2, 128, 32>}, {transform_indices = @transform_1, window_bounds = array<i64: 2, 16, 128>}, {transform_indices = @transform_2, window_bounds = array<i64: 2, 1>}, {pipeline_mode = #tpu.pipeline_mode<synchronous>, transform_indices = @transform_3, window_bounds = array<i64: 32, 128>}, {pipeline_mode = #tpu.pipeline_mode<synchronous>, transform_indices = @transform_4, window_bounds = array<i64: 1, 128>}, {transform_indices = @transform_5, window_bounds = array<i64: 2, 128>}]} {
    %c0_i32 = arith.constant 0 : i32
    %0 = arith.cmpi eq, %arg1, %c0_i32 : i32
    %1 = arith.extui %0 : i1 to i32
    %c0_i32_0 = arith.constant 0 : i32
    %2 = arith.cmpi ne, %1, %c0_i32_0 : i32
    scf.if %2 {
      %cst_12 = arith.constant 0.000000e+00 : f32
      %13 = vector.broadcast %cst_12 : f32 to vector<2x32xf32>
      %c0_13 = arith.constant 0 : index
      %c0_14 = arith.constant 0 : index
      %14 = vector.load %arg8[%c0_13, %c0_14] : memref<2x32xf32, #tpu.memory_space<vmem>>, vector<2x32xf32>
      tpu.vector_store %arg8[%c0_13, %c0_14], %13 {strides = array<i32>} : memref<2x32xf32, #tpu.memory_space<vmem>>, vector<2x32xf32>,
    } else {
    }
    %c0 = arith.constant 0 : index
    %c0_1 = arith.constant 0 : index
    %c0_2 = arith.constant 0 : index
    %3 = vector.load %arg3[%c0, %c0_1, %c0_2] : memref<2x16x128xbf16, #tpu.memory_space<vmem>>, vector<2x16x128xbf16>
    %c0_3 = arith.constant 0 : index
    %c0_4 = arith.constant 0 : index
    %c0_5 = arith.constant 0 : index
    %4 = vector.load %arg2[%c0_3, %c0_4, %c0_5] : memref<2x128x32xbf16, #tpu.memory_space<vmem>>, vector<2x128x32xbf16>
    %cst = arith.constant dense<0.000000e+00> : vector<2x16x32xf32>
    %5 = tpu.matmul %3, %4, %cst {dimension_numbers = #tpu.dot_dimension_numbers<[2], [1], [1], [2], [0, 0, 0, 1, 1, 2], [0], [0]>} : vector<2x16x128xbf16>, vector<2x128x32xbf16>, vector<2x16x32xf32> -> vector<2x16x32xf32>
    %c0_6 = arith.constant 0 : index
    %c0_7 = arith.constant 0 : index
    %6 = vector.load %arg8[%c0_6, %c0_7] : memref<2x32xf32, #tpu.memory_space<vmem>>, vector<2x32xf32>
    %cst_8 = arith.constant dense<0.000000e+00> : vector<2x32xf32>
    %7 = vector.multi_reduction <add>, %5, %cst_8 [1] : vector<2x16x32xf32> to vector<2x32xf32>
    %8 = arith.addf %6, %7 : vector<2x32xf32>
    %c0_9 = arith.constant 0 : index
    %c0_10 = arith.constant 0 : index
    %9 = vector.load %arg8[%c0_9, %c0_10] : memref<2x32xf32, #tpu.memory_space<vmem>>, vector<2x32xf32>
    tpu.vector_store %arg8[%c0_9, %c0_10], %8 {strides = array<i32>} : memref<2x32xf32, #tpu.memory_space<vmem>>, vector<2x32xf32>,
    %c1_i32 = arith.constant 1 : i32
    %10 = arith.cmpi eq, %arg1, %c1_i32 : i32
    %11 = arith.extui %10 : i1 to i32
    %c0_i32_11 = arith.constant 0 : i32
    %12 = arith.cmpi ne, %11, %c0_i32_11 : i32
    scf.if %12 {
      %c0_12 = arith.constant 0 : index
      %c0_13 = arith.constant 0 : index
      %13 = vector.load %arg8[%c0_12, %c0_13] : memref<2x32xf32, #tpu.memory_space<vmem>>, vector<2x32xf32>
      %c0_14 = arith.constant 0 : index
      %c0_15 = arith.constant 0 : index
      %14 = vector.load %arg4[%c0_14, %c0_15] : memref<2x1xf32, #tpu.memory_space<vmem>>, vector<2x1xf32>
      %cst_16 = arith.constant 1.000000e-10 : f32
      %15 = vector.broadcast %cst_16 : f32 to vector<2x1xf32>
      %16 = arith.addf %14, %15 : vector<2x1xf32>
      %17 = vector.broadcast %16 : vector<2x1xf32> to vector<2x32xf32>
      %18 = arith.divf %13, %17 : vector<2x32xf32>
      %c0_17 = arith.constant 0 : index
      %c0_18 = arith.constant 0 : index
      %19 = vector.load %arg5[%c0_17, %c0_18] : memref<32x128xf32, #tpu.memory_space<vmem>>, vector<32x128xf32>
      %cst_19 = arith.constant dense<0.000000e+00> : vector<2x128xf32>
      %20 = tpu.matmul %18, %19, %cst_19 {dimension_numbers = #tpu.dot_dimension_numbers<[1], [0], [0], [1], [0, 0, 1, 1], [], []>} : vector<2x32xf32>, vector<32x128xf32>, vector<2x128xf32> -> vector<2x128xf32>
      %c0_20 = arith.constant 0 : index
      %c0_21 = arith.constant 0 : index
      %21 = vector.load %arg6[%c0_20, %c0_21] : memref<1x128xf32, #tpu.memory_space<vmem>>, vector<1x128xf32>
      %22 = vector.broadcast %21 : vector<1x128xf32> to vector<2x128xf32>
      %23 = arith.addf %20, %22 : vector<2x128xf32>
      %cst_22 = arith.constant dense<0xFF800000> : vector<2xf32>
      %24 = vector.multi_reduction <maximumf>, %23, %cst_22 [1] : vector<2x128xf32> to vector<2xf32>
      %25 = vector.shape_cast %24 : vector<2xf32> to vector<2x1xf32>
      %26 = vector.broadcast %25 : vector<2x1xf32> to vector<2x128xf32>
      %27 = arith.subf %23, %26 : vector<2x128xf32>
      %28 = math.exp %27 : vector<2x128xf32>
      %cst_23 = arith.constant dense<0.000000e+00> : vector<2xf32>
      %29 = vector.multi_reduction <add>, %28, %cst_23 [1] : vector<2x128xf32> to vector<2xf32>
      %30 = vector.shape_cast %29 : vector<2xf32> to vector<2x1xf32>
      %31 = math.log %30 : vector<2x1xf32>
      %32 = vector.broadcast %31 : vector<2x1xf32> to vector<2x128xf32>
      %33 = arith.subf %27, %32 : vector<2x128xf32>
      %c0_24 = arith.constant 0 : index
      %c0_25 = arith.constant 0 : index
      %34 = vector.load %arg7[%c0_24, %c0_25] : memref<2x128xf32, #tpu.memory_space<vmem>>, vector<2x128xf32>
      tpu.vector_store %arg7[%c0_24, %c0_25], %33 {strides = array<i32>} : memref<2x128xf32, #tpu.memory_space<vmem>>, vector<2x128xf32>,
    } else {
    }
    return
  }
  func.func @transform_0(%arg0: i32, %arg1: i32) -> (i32, i32, i32) {
    %c0_i32 = arith.constant 0 : i32
    %c0_i32_0 = arith.constant 0 : i32
    return %arg0, %arg1, %c0_i32 : i32, i32, i32
  }
  func.func @transform_1(%arg0: i32, %arg1: i32) -> (i32, i32, i32) {
    %c0_i32 = arith.constant 0 : i32
    %c0_i32_0 = arith.constant 0 : i32
    return %arg0, %c0_i32, %arg1 : i32, i32, i32
  }
  func.func @transform_2(%arg0: i32, %arg1: i32) -> (i32, i32) {
    %c0_i32 = arith.constant 0 : i32
    %c0_i32_0 = arith.constant 0 : i32
    return %arg0, %c0_i32 : i32, i32
  }
  func.func @transform_3(%arg0: i32, %arg1: i32) -> (i32, i32) {
    %c0_i32 = arith.constant 0 : i32
    %c0_i32_0 = arith.constant 0 : i32
    %c0_i32_1 = arith.constant 0 : i32
    return %c0_i32, %c0_i32_0 : i32, i32
  }
  func.func @transform_4(%arg0: i32, %arg1: i32) -> (i32, i32) {
    %c0_i32 = arith.constant 0 : i32
    %c0_i32_0 = arith.constant 0 : i32
    %c0_i32_1 = arith.constant 0 : i32
    return %c0_i32, %c0_i32_0 : i32, i32
  }
  func.func @transform_5(%arg0: i32, %arg1: i32) -> (i32, i32) {
    %c0_i32 = arith.constant 0 : i32
    %c0_i32_0 = arith.constant 0 : i32
    return %arg0, %c0_i32 : i32, i32
  }
}

</mosaic_0001>

<bundles_post_ra>
// kernel: tpu_custom_call.1
= control target key start
LH: loop header
LB: loop body
LE: loop exit
PB: predicated region body
PF: predicated region fallthrough
CT: control target
= control target key end

     0   :  { %10 = vsyncpa [#allocation6], 0  ;;  %s1279_s18 = smov 0   ;;  %s1281_s19 = smov 0   ;;  %s1450_s0 = inlined_call_operand.vmem [shape: bf16[2,256,32], index: 0, kind: input, shape index: {}]   ;;  %s1451_s1 = inlined_call_operand.vmem [shape: bf16[2,16,256], index: 1, kind: input, shape index: {}]   ;;  %s1452_s2 = inlined_call_operand.vmem [shape: f32[2,1], index: 2, kind: input, shape index: {}]   ;;  %s1453_s3 = inlined_call_operand.vmem [shape: f32[32,128], index: 3, kind: input, shape index: {}]   ;;  %s1454_s4 = inlined_call_operand.vmem [shape: f32[1,128], index: 4, kind: input, shape index: {}]   ;;  %s1455_s5 = inlined_call_operand.hbm [shape: f32[2,128], index: 5, kind: output, shape index: {}]  }
   0x1   :  { %s1283_s20 = smov 0   ;;  %s1285_s21 = smov 0  }
   0x2   :  { %s1287_s22 = smov 0  }
   0x3 LB: > { %s973_s23 = sadd.s32 4294967295, %s1239_s22   ;;  %s25_s24 = sadd.s32 1, %s1235_s21  ;;  %s1239_s22 = sphi %s1287_s22, %s16_s22   ;;  %s1235_s21 = sphi %s1285_s21, %s1461_s21   ;;  %s1231_s20 = sphi %s1283_s20, %s1460_s20   ;;  %s1227_s19 = sphi %s1281_s19, %s1459_s19   ;;  %s1223_s18 = sphi %s1279_s18, %s1458_s18  }
   0x4   : > { %p26_p0 = scmp.ge.s32.totalorder %s25_s24, 2  ;;  %p44_p1 = scmp.ne.s32.totalorder %s1227_s19, %s1223_s18 }
   0x5   : > { %p45_p2 = scmp.eq.s32.totalorder %s1239_s22, 0  ;;  %s37_s27 = sadd.s32 1, %s1227_s19 }
   0x6   : > { %s1463_s24 = smov (%p26_p0, %s25_s24), 0  ;;  %p976_p5 = scmp.ge.s32.totalorder %s1239_s22, 2 }
   0x7   : > { %p1311_p3 = por %p45_p2, %p44_p1  ;;  %s33_s26 = ssub.s32 %s1235_s21, %s1463_s24 }
   0x8   : > { %p35_p4 = scmp.eq.s32.totalorder %s33_s26, 0  ;;  %205 = sbr.rel (%p976_p5) target bundleno = 34 (0x22), region = 28 }
   0xa   : > { %s1319_s28 = scalar_select %p35_p4, %s1227_s19, %s37_s27  }
   0xf   : > { %208 = sbr.rel (!%p1311_p3) target bundleno = 27 (0x1b), region = 32  ;;  %s210_s29 = sand.u32 (%p1311_p3), 1, %s1227_s19  }
  0x10   : > { %s1011_s30 = sshll.u32 (%p1311_p3), %s1235_s21, 6  ;;  %s977_s6 = sshll.u32 (%p1311_p3), %s210_s29, 7 }
  0x11   : > { %s1329_s9 = scalar_lea.vmem (%p1311_p3), %s1450_s0, %s1011_s30  ;;  %s212_s10 = scalar_lea.vmem (%p1311_p3), [#allocation3], %s977_s6 }
  0x12   : > { %v234_v0 = vld [vmem:[%s1329_s9] sm:$0xff] (%p1311_p3)   ;;  %v238_v1 = vld [vmem:[%s1329_s9 + $0x8] sm:$0xff] (%p1311_p3)   ;;  %v242_v2 = vld [vmem:[%s1329_s9 + $0x10] sm:$0xff] (%p1311_p3)  }
  0x13   : > { %235 = vst [vmem:[%s212_s10] sm:$0xff] (%p1311_p3), %v234_v0   ;;  %239 = vst [vmem:[%s212_s10 + $0x8] sm:$0xff] (%p1311_p3), %v238_v1   ;;  %v246_v3 = vld [vmem:[%s1329_s9 + $0x18] sm:$0xff] (%p1311_p3)   ;;  %v250_v4 = vld [vmem:[%s1329_s9 + $0x20] sm:$0xff] (%p1311_p3)  }
  0x14   : > { %243 = vst [vmem:[%s212_s10 + $0x10] sm:$0xff] (%p1311_p3), %v242_v2   ;;  %v254_v5 = vld [vmem:[%s1329_s9 + $0x28] sm:$0xff] (%p1311_p3)   ;;  %247 = vst [vmem:[%s212_s10 + $0x18] sm:$0xff] (%p1311_p3), %v246_v3   ;;  %v258_v6 = vld [vmem:[%s1329_s9 + $0x30] sm:$0xff] (%p1311_p3)  }
  0x15   : > { %251 = vst [vmem:[%s212_s10 + $0x20] sm:$0xff] (%p1311_p3), %v250_v4   ;;  %255 = vst [vmem:[%s212_s10 + $0x28] sm:$0xff] (%p1311_p3), %v254_v5   ;;  %v262_v7 = vld [vmem:[%s1329_s9 + $0x38] sm:$0xff] (%p1311_p3)   ;;  %v266_v8 = vld [vmem:[%s1329_s9 + $0x80] sm:$0xff] (%p1311_p3)  }
  0x16   : > { %259 = vst [vmem:[%s212_s10 + $0x30] sm:$0xff] %v258_v6   ;;  %263 = vst [vmem:[%s212_s10 + $0x38] sm:$0xff] %v262_v7   ;;  %v270_v9 = vld [vmem:[%s1329_s9 + $0x88] sm:$0xff]   ;;  %v274_v10 = vld [vmem:[%s1329_s9 + $0x90] sm:$0xff]  }
  0x17   : > { %267 = vst [vmem:[%s212_s10 + $0x40] sm:$0xff] %v266_v8   ;;  %v278_v11 = vld [vmem:[%s1329_s9 + $0x98] sm:$0xff]   ;;  %271 = vst [vmem:[%s212_s10 + $0x48] sm:$0xff] %v270_v9   ;;  %v282_v12 = vld [vmem:[%s1329_s9 + $0xa0] sm:$0xff]  }
  0x18   : > { %275 = vst [vmem:[%s212_s10 + $0x50] sm:$0xff] %v274_v10   ;;  %279 = vst [vmem:[%s212_s10 + $0x58] sm:$0xff] %v278_v11   ;;  %v286_v13 = vld [vmem:[%s1329_s9 + $0xa8] sm:$0xff]   ;;  %v290_v14 = vld [vmem:[%s1329_s9 + $0xb0] sm:$0xff]  }
  0x19   : > { %283 = vst [vmem:[%s212_s10 + $0x60] sm:$0xff] %v282_v12   ;;  %287 = vst [vmem:[%s212_s10 + $0x68] sm:$0xff] %v286_v13   ;;  %v294_v15 = vld [vmem:[%s1329_s9 + $0xb8] sm:$0xff]  }
  0x1a   : > { %291 = vst [vmem:[%s212_s10 + $0x70] sm:$0xff] %v290_v14   ;;  %295 = vst [vmem:[%s212_s10 + $0x78] sm:$0xff] %v294_v15  }
  0x1b PF: > { %384 = sbr.rel (!%p1311_p3) target bundleno = 34 (0x22), region = 73  ;;  %s386_s11 = sand.u32 (%p1311_p3), 1, %s1227_s19  }
  0x1c   : > { %s981_s12 = sshll.u32 (%p1311_p3), %s1235_s21, 2  ;;  %s980_s13 = sshll.u32 (%p1311_p3), %s386_s11, 4 }
  0x1d   : > { %s393_s16 = scalar_lea.vmem (%p1311_p3), %s1451_s1, %s981_s12  ;;  %s388_s17 = scalar_lea.vmem (%p1311_p3), [#allocation4], %s980_s13 }
  0x1e   : > { %v409_v16 = vld [vmem:[%s393_s16] sm:$0xf] (%p1311_p3)  ;;  %v411_v17 = vld [vmem:[%s393_s16 + $0x8] sm:$0xf] (%p1311_p3)  ;;  %v413_v18 = vld [vmem:[%s393_s16 + $0x10] sm:$0xf] (%p1311_p3) }
  0x1f   : > { %410 = vst [vmem:[%s388_s17] sm:$0xf] (%p1311_p3), %v409_v16  ;;  %412 = vst [vmem:[%s388_s17 + $0x4] sm:$0xf] (%p1311_p3), %v411_v17  ;;  %v415_v19 = vld [vmem:[%s393_s16 + $0x18] sm:$0xf] (%p1311_p3) }
  0x20   : > { %414 = vst [vmem:[%s388_s17 + $0x8] sm:$0xf] (%p1311_p3), %v413_v18  ;;  %416 = vst [vmem:[%s388_s17 + $0xc] sm:$0xf] (%p1311_p3), %v415_v19 }
  0x22 PF: > { %p982_p6 = scmp.ge.s32.totalorder %s1239_s22, 1  ;;  %p446_p7 = scmp.lt.s32.totalorder %s1239_s22, 3 }
  0x24   : > { %p447_p8 = pnand %p982_p6, %p446_p7 }
  0x25   : > { %s453_s25 = sand.u32 (!%p447_p8), 1, %s1223_s18   ;;  %p985_p9 = scmp.ne.s32.totalorder (!%p447_p8), %s1231_s20, 0 }
  0x26   : > { %450 = sbr.rel (%p447_p8) target bundleno = 884 (0x374), region = 114  ;;  %s983_s26 = sshll.u32 (!%p447_p8), %s453_s25, 7 }
  0x27   : > { %s1357_s27 = sshll.u32 (!%p447_p8), %s453_s25, 4  ;;  %s1359_s29 = scalar_lea.vmem (!%p447_p8), [#allocation3], %s983_s26 }
  0x28   : > { %s462_s30 = scalar_lea.vmem (!%p447_p8), [#allocation4], %s1357_s27 }
  0x2d   : > { %501 = sbr.rel (%p985_p9) target bundleno = 52 (0x34), region = 126  ;;  %vm502_vm0 = vcmask (!%p985_p9), 254976   ;;  %v1241_v20 = vmov (!%p985_p9), 0.0  }
  0x2e   : > { %503 = vst.msk [vmem:[#allocation2] sm:$0x3] (!%p985_p9), %vm502_vm0, %v1241_v20 }
  0x34 PF: > { %v1146_v21 = vld [vmem:[%s1359_s29] sm:$0xff]   ;;  %v1242_v22 = vmov 0.0   ;;  %v1148_v24 = vld [vmem:[%s1359_s29 + $0x8] sm:$0xff]   ;;  %vm1243_vm1 = vmmov 0   ;;  %v1150_v26 = vld [vmem:[%s1359_s29 + $0x10] sm:$0xff]   ;;  %vm731_vm2 = vcmask 261120  }
  0x35   : > { %1035 = vmatprep.subr.bf16.mxu0 %v1242_v22  ;;  %1055 = vmatprep.subr.bf16.mxu1 %v1242_v22  ;;  %v1147_v23 = vld [vmem:[%s1359_s29 + $0x40] sm:$0xff]   ;;  %v1149_v25 = vld [vmem:[%s1359_s29 + $0x48] sm:$0xff]   ;;  %v1151_v27 = vld [vmem:[%s1359_s29 + $0x50] sm:$0xff]   ;;  %vm752_vm3 = vcmask 1041409   ;;  %vm756_vm4 = vcmask 254976   ;;  %p1004_p10 = scmp.ne.s32.totalorder %s1231_s20, 1 }
  0x36   : > { %1036 = vmatpush3.bf16.msra.mxu0 %v1146_v21  ;;  %1051 = vmatprep.mubr.msk.bf16.mxu0 %vm1243_vm1, %v1242_v22  ;;  %v1152_v28 = vld [vmem:[%s1359_s29 + $0x18] sm:$0xff]   ;;  %v1154_v30 = vld [vmem:[%s1359_s29 + $0x20] sm:$0xff]   ;;  %v1156_v32 = vld [vmem:[%s1359_s29 + $0x28] sm:$0xff]   ;;  %v1244_v6 = vmov (!%p1004_p10), 0   ;;  %v1245_v11 = vmov (!%p1004_p10), 0.0|0.0   ;;  %vm1246_vm5 = vmmov (!%p1004_p10), 0  }
  0x37   : > { %1056 = vmatpush3.bf16.msra.mxu1 %v1147_v23  ;;  %1037 = vmatprep.subr.bf16.mxu0 %v1242_v22  ;;  %v1153_v29 = vld [vmem:[%s1359_s29 + $0x58] sm:$0xff]   ;;  %v1155_v31 = vld [vmem:[%s1359_s29 + $0x60] sm:$0xff]   ;;  %v1157_v33 = vld [vmem:[%s1359_s29 + $0x68] sm:$0xff]   ;;  %v1247_v14 = vmov (!%p1004_p10), 0.0   ;;  %vm856_vm6 = vcmask (!%p1004_p10), 1041408  }
  0x38   : > { %1057 = vmatprep.subr.bf16.mxu1 %v1242_v22  ;;  %1071 = vmatprep.mubr.msk.bf16.mxu1 %vm1243_vm1, %v1242_v22  ;;  %v1158_v34 = vld [vmem:[%s1359_s29 + $0x30] sm:$0xff]   ;;  %v1160_v36 = vld [vmem:[%s1359_s29 + $0x38] sm:$0xff]   ;;  %v773_v9 = vld [vmem:[%s1453_s3 + $0x8] sm:$0xff] (!%p1004_p10) }
  0x39   : > { %v1159_v35 = vld [vmem:[%s1359_s29 + $0x70] sm:$0xff]   ;;  %v1161_v37 = vld [vmem:[%s1359_s29 + $0x78] sm:$0xff]   ;;  %1164 = vset.pattern.permute.xlu0 (!%p1004_p10), %v1244_v6 }
  0x3a   : > { %1038 = vmatpush3.bf16.msra.mxu0 %v1148_v24  ;;  %v1162_v38 = vld [vmem:[%s462_s30] sm:$0xff]   ;;  %v1163_v39 = vld [vmem:[%s462_s30 + $0x8] sm:$0xff]  }
  0x3b   : > { %1058 = vmatpush3.bf16.msra.mxu1 %v1149_v25  ;;  %1039 = vmatprep.subr.bf16.mxu0 %v1242_v22  ;;  %v730_v1 = vld [vmem:[#allocation2] sm:$0x3]  ;;  %v774_v10 = vld [vmem:[%s1453_s3 + $0x10] sm:$0xff] (!%p1004_p10)  ;;  %v775_v13 = vld [vmem:[%s1453_s3 + $0x18] sm:$0xff] (!%p1004_p10) }
  0x3c   : > { %1059 = vmatprep.subr.bf16.mxu1 %v1242_v22  ;;  %v763_v5 = vld [vmem:[%s1452_s2] sm:$0x3] (!%p1004_p10)  ;;  %v1090_v15 = vpack.c.bf16 (!%p1004_p10), %v775_v13, %v774_v10 }
  0x3d   : > { %v764_v7 = vadd.f32 (!%p1004_p10), 1e-10, %v763_v5  ;;  %v772_v8 = vld [vmem:[%s1453_s3] sm:$0xff] (!%p1004_p10) }
  0x3e   : > { %1040 = vmatpush3.bf16.msra.mxu0 %v1150_v26  ;;  %v1087_v12 = vpack.c.bf16 (!%p1004_p10), %v773_v9, %v772_v8  ;;  %v1005_v20 = vld [vmem:[%s1454_s4] ss:$0 sm:$0xff] (!%p1004_p10) }
  0x3f   : > { %1060 = vmatpush3.bf16.msra.mxu1 %v1151_v27  ;;  %1041 = vmatprep.subr.bf16.mxu0 %v1242_v22 }
  0x40   : > { %1061 = vmatprep.subr.bf16.mxu1 %v1242_v22  ;;  %767 = vperm.xlu0 (!%p1004_p10), %1164, %v764_v7  }
  0x42   : > { %1042 = vmatpush3.bf16.msra.mxu0 %v1152_v28 }
  0x43   : > { %1062 = vmatpush3.bf16.msra.mxu1 %v1153_v29  ;;  %1043 = vmatprep.subr.bf16.mxu0 %v1242_v22 }
  0x44   : > { %1063 = vmatprep.subr.bf16.mxu1 %v1242_v22 }
  0x46   : > { %1044 = vmatpush3.bf16.msra.mxu0 %v1154_v30 }
  0x47   : > { %1064 = vmatpush3.bf16.msra.mxu1 %v1155_v31  ;;  %1045 = vmatprep.subr.bf16.mxu0 %v1242_v22 }
  0x48   : > { %1065 = vmatprep.subr.bf16.mxu1 %v1242_v22 }
  0x4a   : > { %1046 = vmatpush3.bf16.msra.mxu0 %v1156_v32 }
  0x4b   : > { %1066 = vmatpush3.bf16.msra.mxu1 %v1157_v33  ;;  %1047 = vmatprep.subr.bf16.mxu0 %v1242_v22 }
  0x4c   : > { %1067 = vmatprep.subr.bf16.mxu1 %v1242_v22 }
  0x4e   : > { %1048 = vmatpush3.bf16.msra.mxu0 %v1158_v34 }
  0x4f   : > { %1068 = vmatpush3.bf16.msra.mxu1 %v1159_v35  ;;  %1049 = vmatprep.subr.bf16.mxu0 %v1242_v22 }
  0x50   : > { %1069 = vmatprep.subr.bf16.mxu1 %v1242_v22 }
  0x52   : > { %1050 = vmatpush3.bf16.msra.mxu0 %v1160_v36 }
  0x53   : > { %1070 = vmatpush3.bf16.msra.mxu1 %v1161_v37  ;;  %1086 = vmatprep.subr.bf16.mxu0 (!%p1004_p10), %v1245_v11 }
  0x55   : > { %1052 = vmatmul.mubr.bf16.vlgmr.msra.gmra.mrb[0].mxu0 %v1162_v38 }
  0x56   : > { %1072 = vmatmul.mubr.bf16.vlgmr.msra.gmra.mrb[0].mxu1 %v1163_v39  ;;  %1083 = vmatprep.mubr.msk.f32.mxu0 (!%p1004_p10), %vm1246_vm5, %v1247_v14 }
  0x57   : > { %1088 = vmatpush3.bf16.msra.mxu0 (!%p1004_p10), %v1087_v12 }
  0x58   : > { %1089 = vmatprep.subr.bf16.mxu0 (!%p1004_p10), %v1245_v11 }
  0x5b   : > { %1091 = vmatpush3.bf16.msra.mxu0 (!%p1004_p10), %v1090_v15 }
  0xbf   : > { %v768_v16 = vpop.permute.xlu0 (!%p1004_p10), %767 }
  0xc0   : > { %1165 = vrcp.f32 (!%p1004_p10), %v768_v16 }
  0xca   : > { %v1166_v18 = vpop.eup (!%p1004_p10), %1165 }
 0x128   : > { %v628_v40 = vpop.f32.mrb[0].mxu0 }
 0x129   : > { %v723_v41 = vpop.f32.mrb[0].mxu1  ;;  %v1053_v42 = vpop.f32.mrb[1].mxu0  ;;  %v732_v45 = vsel %vm731_vm2, %v628_v40, 0.0 }
 0x12a   : > { %v1073_v43 = vpop.f32.mrb[1].mxu1  ;;  %v631_v44 = vpop.f32.mrb[2].mxu0  ;;  %v741_v49 = vsel %vm731_vm2, %v723_v41, 0.0 }
 0x12b   : > { %v733_v46 = vsel %vm731_vm2, %v631_v44, 0.0  ;;  %v726_v47 = vpop.f32.mrb[2].mxu1  ;;  %v1054_v48 = vpop.f32.mrb[3].mxu0 }
 0x12c   : > { %v734_v50 = vadd.f32 %v733_v46, %v732_v45  ;;  %v742_v51 = vsel %vm731_vm2, %v726_v47, 0.0  ;;  %v1074_v52 = vpop.f32.mrb[3].mxu1 }
 0x12d   : > { %v743_v53 = vadd.f32 %v742_v51, %v741_v49 }
 0x12e   : > { %v735_v54 = vrot.slane %v734_v50, 4 }
 0x12f   : > { %v744_v55 = vrot.slane %v743_v53, 4 }
 0x130   : > { %v736_v56 = vadd.f32 %v735_v54, %v734_v50 }
 0x131   : > { %v745_v57 = vadd.f32 %v744_v55, %v743_v53 }
 0x132   : > { %v737_v58 = vrot.slane %v736_v56, 2 }
 0x133   : > { %v746_v59 = vrot.slane %v745_v57, 2 }
 0x134   : > { %v738_v60 = vadd.f32 %v737_v58, %v736_v56 }
 0x135   : > { %v747_v61 = vadd.f32 %v746_v59, %v745_v57 }
 0x136   : > { %v739_v62 = vrot.slane %v738_v60, 1 }
 0x137   : > { %v748_v63 = vrot.slane %v747_v61, 1 }
 0x138   : > { %v740_v0 = vadd.f32 %v739_v62, %v738_v60  ;;  %761 = sbr.rel (%p1004_p10) target bundleno = 859 (0x35b), region = 130 }
 0x139   : > { %v749_v2 = vadd.f32 %v748_v63, %v747_v61 }
 0x13b   : > { %v753_v3 = vsel %vm752_vm3, %v749_v2, %v740_v0 }
 0x13c   : > { %v755_v4 = vadd.f32 %v753_v3, %v730_v1 }
 0x13e   : > { %757 = vst.msk [vmem:[#allocation2] sm:$0x3] %vm756_vm4, %v755_v4 }
 0x145   : > { %v762_v17 = vld [vmem:[#allocation2] sm:$0x3] }
 0x146   : > { %v771_v19 = vmul.f32 %v1166_v18, %v762_v17 }
 0x148   : > { %1084 = vmatmul.mubr.msk.f32.vlgmr.msra.gmra.mrb[0].mxu0 %vm731_vm2, %v771_v19 }
 0x21b   : > { %v852_v21 = vpop.f32.mrb[0].mxu0 }
 0x21c   : > { %v853_v22 = vadd.f32 %v1005_v20, %v852_v21  ;;  %v1085_v23 = vpop.f32.mrb[1].mxu0 }
 0x21e   : > { %v857_v24 = vsel %vm856_vm6, %v853_v22, -inf }
 0x21f   : > { %858 = vmax.xlane.f32.xlu0 %v857_v24 }
 0x2ac   : > { %v859_v25 = vpop.xlane.xlu0 %858 }
 0x2ad   : > { %v860_v26 = vsub.f32 %v853_v22, %v859_v25 }
 0x2af   : > { %v861_v27 = vmul.f32 1.442695, %v860_v26 }
 0x2b1   : > { %1167 = vpow2.f32 %v861_v27 }
 0x2bb   : > { %v1168_v28 = vpop.eup %1167 }
 0x2bc   : > { %v863_v29 = vsel %vm856_vm6, %v1168_v28, 0.0 }
 0x2bd   : > { %864 = vadd.xlane.f32.xlu1 %v863_v29 }
 0x34a   : > { %v865_v30 = vpop.xlane.xlu1 %864 }
 0x34b   : > { %1169 = vlog2.f32 %v865_v30 }
 0x355   : > { %v1170_v31 = vpop.eup %1169 }
 0x356   : > { %v867_v32 = vmul.f32 0.6931472, %v1170_v31 }
 0x358   : > { %v868_v33 = vsub.f32 %v860_v26, %v867_v32 }
 0x35a   : > { %869 = vst [vmem:[#allocation5] sm:$0x3] %v868_v33 }
 0x35b PF: > { %p1409_p11 = scmp.eq.s32.totalorder %s973_s23, 1  ;;  %s1248_s17 = smov [#allocation5]  }
 0x35c   : > { %s879_s25 = sshll.u32 %s1248_s17, 4  ;;  %s880_s25 = int_to_ptr.vmem [resolvable:$true] %s879_s25 }
 0x35d   : > { %s1171_s26 = scalar_lea.vmem %s880_s25, 32  ;;  %p1178_p1 = scmp.lt.s32.totalorder %s880_s25, %s880_s25 }
 0x35e   : > { %p1172_p12 = scmp.ne.s32.totalorder %s880_s25, %s1171_s26  ;;  %p1179_p2 = scmp.lt.s32.totalorder %s1171_s26, %s1171_s26 }
 0x360   : > { %p1173_p13 = pnand %p1172_p12, %p1409_p11  ;;  %p1180_p3 = por %p1179_p2, %p1178_p1 }
 0x362   : > { %p1174_p0 = pneg %p1173_p13 }
 0x364   : > { %p1181_p4 = pnand %p1180_p3, %p1174_p0 }
 0x366   : > { %1184 = shalt.err (!%p1181_p4)
}
 0x367   : > { %s1185_s23 = scalar_lea.hbm %s1455_s5, 32 }
 0x368   : > { %p1186_p5 = scmp.ne.s32.totalorder %s1455_s5, %s1185_s23  ;;  %p1191_p8 = scmp.lt.u32.totalorder %s1185_s23, %s1455_s5 }
 0x36a   : > { %p1187_p6 = pnand %p1186_p5, %p1409_p11 }
 0x36c   : > { %p1188_p7 = pneg %p1187_p6 }
 0x36e   : > { %p1193_p9 = pnand %p1191_p8, %p1188_p7 }
 0x370   : > { %1196 = shalt.err (!%p1193_p9)
}
 0x371   : > { %1093 = dma.vmem_to_hbm [thread:$0]  (%p1409_p11), %s880_s25, 32, %s1455_s5, [#allocation6]  }
 0x372   : > { %1218 = dma.done.wait (%p1409_p11), [#allocation6], 32  }
 0x373   : > { %1220 = vsyncadd (%p1409_p11), [#allocation6], 4294967264 }
 0x374 PF: > { %s16_s22 = sadd.s32 1, %s1239_s22   ;;  %s1458_s18 = smov %s1227_s19 }
 0x375   : > { %p13_p10 = scmp.ge.s32.totalorder %s16_s22, 4   ;;  %s1459_s19 = smov %s1319_s28 }
 0x376   : > { %s1460_s20 = smov %s1235_s21  ;;  %s1461_s21 = smov %s1463_s24 }
 0x377   :  { %15 = sbr.rel (!%p13_p10) target bundleno = 3 (0x3), region = 174 }
 0x37e   :  { %892 = vsyncpa [#allocation6], 1 }
 0x37f   :  { %894 = vsyncpa [#allocation6 + $0x1], 1 }

</bundles_post_ra>
